<compile_context>
chip_gen: v6e
topology: v6e:2x2x1
jax: 0.10.0
libtpu: 0.0.40
codegen_flags: <defaults>
</compile_context>

<pallas_src>
import functools

import jax
import jax.numpy as jnp
from jax import lax
from jax.experimental import pallas as pl
from jax.experimental.pallas import tpu as pltpu


_LANE = 128
_MAX_TILE = 32 * 1024                  # lanes per edge tile (review: 8K-32K)
_FAST_PATH_BYTES = 4 * 1024 * 1024     # single-block fast-path VMEM budget
_LOGITS_VMEM_BYTES = 16 * 1024 * 1024  # staged-logits scratch budget (v7x-safe)
_VMEM_LIMIT_BYTES = 32 * 1024 * 1024   # well under v7x's 64 MiB physical VMEM


def _round_up(x, m):
    return (x + m - 1) // m * m


def _attn_small_kernel(e_ref, w_ref, alpha_ref):
    """Single-step path: whole [edge_dim, E] block resident in VMEM."""
    # Projection a[e] = sum_d w[d] * e[d, e]: VPU multiply + sublane reduce
    # (an (edge_dim x 1) matmul would waste the MXU; VPU/XLU have full slack).
    a = jnp.sum(e_ref[...] * w_ref[...], axis=0, keepdims=True)      # [1, E]
    m = jnp.max(a, axis=1, keepdims=True)
    p = jnp.exp(a - m)
    inv_l = pl.reciprocal(jnp.sum(p, axis=1, keepdims=True), approx=False)
    alpha_ref[...] = p * inv_l                                        # lane-dense store


def _attn_tiled_kernel(e_ref, w_ref, alpha_ref, logits_ref, m_ref, l_ref,
                       *, n_edges, tile):
    """Two-pass path.

    Pass 0: per-tile logits (edges read once) staged into VMEM scratch +
            online-softmax running (max, sum).
    Pass 1: normalize from the staged logits; no edge re-read (the edge
            index_map is pinned in pass 1 so those DMAs are elided).
    """
    p = pl.program_id(0)      # 0: stats pass, 1: normalize pass
    t = pl.program_id(1)      # lane-tile index

    @pl.when((p == 0) & (t == 0))
    def _():
        m_ref[...] = jnp.full_like(m_ref, -jnp.inf)
        l_ref[...] = jnp.zeros_like(l_ref)

    @pl.when(p == 0)
    def _():
        a = jnp.sum(e_ref[...] * w_ref[...], axis=0, keepdims=True)  # [1, TE]
        if n_edges % tile != 0:
            # cdiv grid: mask the garbage tail lanes of the last (partial) tile.
            lane = lax.broadcasted_iota(jnp.int32, a.shape, 1) + t * tile
            a = jnp.where(lane < n_edges, a, -jnp.inf)
        logits_ref[pl.ds(t, 1), :] = a            # stage logits (VMEM, no HBM)
        m_prev = m_ref[...]
        m_new = jnp.maximum(m_prev, jnp.max(a, axis=1, keepdims=True))
        l_ref[...] = (l_ref[...] * jnp.exp(m_prev - m_new)
                      + jnp.sum(jnp.exp(a - m_new), axis=1, keepdims=True))
        m_ref[...] = m_new

    @pl.when(p == 1)
    def _():
        a = logits_ref[pl.ds(t, 1), :]            # [1, TE] from VMEM scratch
        inv_l = pl.reciprocal(l_ref[...], approx=False)
        alpha_ref[...] = jnp.exp(a - m_ref[...]) * inv_l              # lane-dense store


def slayer_forward(node_features, edge_features_de, w_attn, *, edge_tile=None):
    """sLayer.forward.

    Args:
      node_features:    [N, node_dim]   -- returned unchanged (module semantics).
      edge_features_de: [edge_dim, E]   -- edge features stored EDGE-MAJOR
          (edges on the fast/lane axis). Guarantee this storage layout
          upstream; transposing a PyTorch [E, edge_dim] tensor here would cost
          a full read+write of the edge array.
      w_attn:           [edge_dim, 1]   -- e_group_attn_fc weight, transposed.
      edge_tile: optional lane-tile override (multiple of 128); forces the
          tiled two-pass path (used by the tests below).

    Returns:
      (h, alpha): h == node_features (module return value); alpha = softmax
      attention scores the DGL callback computes as a side effect, kept
      lane-dense as [1, E] (reshape at the consumer if [E, 1] is required).
    """
    edge_dim, E = edge_features_de.shape
    assert w_attn.shape == (edge_dim, 1)

    h = node_features            # forward() returns node features unchanged

    sub = _round_up(edge_dim, 8)
    e_pad = _round_up(E, _LANE)

    cost = pl.CostEstimate(
        flops=int(2 * E * edge_dim + 8 * E),
        transcendentals=int(2 * E),
        bytes_accessed=int(4 * (E * edge_dim + E + edge_dim)),  # edges read ONCE
    )

    # ---- single-step fast path: whole edge block fits comfortably in VMEM ----
    full_block_bytes = 4 * (sub + 8) * e_pad     # edge block + (1, E) out block
    if edge_tile is None and full_block_bytes <= _FAST_PATH_BYTES:
        alpha = pl.pallas_call(
            _attn_small_kernel,
            out_shape=jax.ShapeDtypeStruct((1, E), jnp.float32),
            compiler_params=pltpu.CompilerParams(
                vmem_limit_bytes=_VMEM_LIMIT_BYTES),
            cost_estimate=cost,
        )(edge_features_de, w_attn)
        return h, alpha

    # ---- tiled two-pass path ----
    if edge_tile is None:
        te = min(_MAX_TILE, e_pad)
    else:
        assert edge_tile % _LANE == 0, "edge_tile must be a multiple of 128"
        te = edge_tile
    num_tiles = pl.cdiv(E, te)

    logits_bytes = 4 * _round_up(num_tiles, 8) * te
    if logits_bytes > _LOGITS_VMEM_BYTES:
        # TODO(synk): for very large E (beyond ~4M edges), stage logits through
        # the alpha output (input_output_aliases) or recompute them in pass 1
        # instead of holding them in VMEM (v7x has only 64 MiB of VMEM).
        raise NotImplementedError("edge count too large for VMEM-staged logits")

    kernel = functools.partial(_attn_tiled_kernel, n_edges=E, tile=te)
    alpha = pl.pallas_call(
        kernel,
        out_shape=jax.ShapeDtypeStruct((1, E), jnp.float32),
        grid_spec=pltpu.PrefetchScalarGridSpec(
            num_scalar_prefetch=0,
            grid=(2, num_tiles),
            in_specs=[
                # Pass 0 walks the edge tiles; pass 1 pins the block index so
                # Pallas elides every pass-1 edge DMA (logits live in VMEM).
                pl.BlockSpec(
                    (edge_dim, te),
                    lambda p, t: (0, t * (1 - p) + (num_tiles - 1) * p)),
                pl.BlockSpec((edge_dim, 1), lambda p, t: (0, 0)),
            ],
            # Pass 0 writes nothing; pinning its output index avoids a garbage
            # writeback stream during the stats pass.
            out_specs=pl.BlockSpec((1, te), lambda p, t: (0, t * p)),
            scratch_shapes=[
                pltpu.VMEM((num_tiles, te), jnp.float32),   # staged logits
                pltpu.VMEM((1, 1), jnp.float32),            # running max m
                pltpu.VMEM((1, 1), jnp.float32),            # running sum l
            ],
        ),
        compiler_params=pltpu.CompilerParams(
            # Tile axis carries the online-softmax reduction through shared
            # scratch, so it must stay "arbitrary".
            # TODO(synk): on v7x, split the edge range over the 2 TensorCores
            # (leading "parallel" axis with per-core partial (m, l) combined
            # once) to reclaim the second core's HBM bandwidth.
            dimension_semantics=("arbitrary", "arbitrary"),
            vmem_limit_bytes=_VMEM_LIMIT_BYTES),
        cost_estimate=cost,
    )(edge_features_de, w_attn)
    return h, alpha


if __name__ == "__main__":
    key = jax.random.PRNGKey(0)
    k1, k2, k3 = jax.random.split(key, 3)

    N, node_dim = 8, 16
    edge_dim = 8
    # self.linear (edge_dim -> out_feats) is unused in forward(); not built.

    node_features = jax.random.normal(k1, (N, node_dim), dtype=jnp.float32)
    # e_group_attn_fc = nn.Linear(edge_dim, 1, bias=False); weight held
    # transposed as [edge_dim, 1], deterministically initialized.
    w_attn = jax.random.normal(k3, (edge_dim, 1), dtype=jnp.float32) * 0.1

    # (E, forced tile): 1) single-step fast path, 2) tiled two-pass with
    # divisible tiles, 3) tiled two-pass with a partial (masked) last tile.
    cases = [(256, None), (1024, 256), (200, 128)]
    for E, tile in cases:
        # Edge features are generated directly in the edge-major [edge_dim, E]
        # storage layout the kernel ingests (no wrapper transpose).
        edge_de = jax.random.normal(jax.random.fold_in(k2, E),
                                    (edge_dim, E), dtype=jnp.float32)

        # Pure-JAX reference of the computed semantics: Linear(edge_dim, 1,
        # bias=False) followed by softmax over all edges (f32 reduce).
        ref_logits = jnp.sum(edge_de * w_attn, axis=0)          # [E]
        ref_alpha = jax.nn.softmax(ref_logits)                  # [E]

        h, alpha = slayer_forward(node_features, edge_de, w_attn,
                                  edge_tile=tile)
        jax.block_until_ready((h, alpha))

        assert h.shape == (N, node_dim)
        assert jnp.array_equal(h, node_features), \
            "forward must return node_features unchanged"
        assert alpha.shape == (1, E)
        assert jnp.allclose(alpha[0], ref_alpha, atol=1e-5, rtol=1e-5), \
            f"alpha mismatch for E={E}, tile={tile}"
        assert jnp.allclose(jnp.sum(alpha), 1.0, atol=1e-5)

    print("KERNEL_OK")
</pallas_src>

<mosaic_0001>
module attributes {stable_mosaic.version = 11 : i64} {
  func.func @_attn_small_kernel(%arg0: memref<8x256xf32, #tpu.memory_space<vmem>>, %arg1: memref<8x1xf32, #tpu.memory_space<vmem>>, %arg2: memref<1x256xf32, #tpu.memory_space<vmem>>) attributes {dimension_semantics = [], scalar_prefetch = 0 : i64, scratch_operands = 0 : i64, tpu.core_type = #tpu.core_type<tc>} {
    %c0 = arith.constant 0 : index
    %c0_0 = arith.constant 0 : index
    %0 = vector.load %arg0[%c0, %c0_0] : memref<8x256xf32, #tpu.memory_space<vmem>>, vector<8x256xf32>
    %c0_1 = arith.constant 0 : index
    %c0_2 = arith.constant 0 : index
    %1 = vector.load %arg1[%c0_1, %c0_2] : memref<8x1xf32, #tpu.memory_space<vmem>>, vector<8x1xf32>
    %2 = vector.broadcast %1 : vector<8x1xf32> to vector<8x256xf32>
    %3 = arith.mulf %0, %2 : vector<8x256xf32>
    %cst = arith.constant dense<0.000000e+00> : vector<256xf32>
    %4 = vector.multi_reduction <add>, %3, %cst [0] : vector<8x256xf32> to vector<256xf32>
    %5 = vector.shape_cast %4 : vector<256xf32> to vector<1x256xf32>
    %cst_3 = arith.constant dense<0xFF800000> : vector<1xf32>
    %6 = vector.multi_reduction <maximumf>, %5, %cst_3 [1] : vector<1x256xf32> to vector<1xf32>
    %7 = vector.shape_cast %6 : vector<1xf32> to vector<1x1xf32>
    %8 = vector.broadcast %7 : vector<1x1xf32> to vector<1x256xf32>
    %9 = arith.subf %5, %8 : vector<1x256xf32>
    %10 = math.exp %9 : vector<1x256xf32>
    %cst_4 = arith.constant dense<0.000000e+00> : vector<1xf32>
    %11 = vector.multi_reduction <add>, %10, %cst_4 [1] : vector<1x256xf32> to vector<1xf32>
    %12 = vector.shape_cast %11 : vector<1xf32> to vector<1x1xf32>
    %13 = tpu.reciprocal %12 : vector<1x1xf32> -> vector<1x1xf32>
    %14 = vector.broadcast %13 : vector<1x1xf32> to vector<1x256xf32>
    %15 = arith.mulf %10, %14 : vector<1x256xf32>
    %c0_5 = arith.constant 0 : index
    %c0_6 = arith.constant 0 : index
    %16 = vector.load %arg2[%c0_5, %c0_6] : memref<1x256xf32, #tpu.memory_space<vmem>>, vector<1x256xf32>
    tpu.vector_store %arg2[%c0_5, %c0_6], %15 {strides = array<i32>} : memref<1x256xf32, #tpu.memory_space<vmem>>, vector<1x256xf32>,
    return
  }
}

</mosaic_0001>

<bundles_post_ra>
// kernel: tpu_custom_call.1
= control target key start
LH: loop header
LB: loop body
LE: loop exit
PB: predicated region body
PF: predicated region fallthrough
CT: control target
= control target key end

     0   :  { %7 = vsyncpa [#allocation3], 0  ;;  %s182_s0 = inlined_call_operand.hbm [shape: f32[8,256], index: 0, kind: input, shape index: {}]   ;;  %s183_s1 = inlined_call_operand.vmem [shape: f32[8,1], index: 1, kind: input, shape index: {}]   ;;  %s184_s2 = inlined_call_operand.hbm [shape: f32[1,256], index: 2, kind: output, shape index: {}]  }
   0x1   :  { %8 = vsyncpa [#allocation4], 0  ;;  %s154_s9 = smov [#allocation2]  }
   0x2   :  { %s15_s10 = sshll.u32 %s154_s9, 4  ;;  %s16_s10 = int_to_ptr.vmem [resolvable:$true] %s15_s10 }
   0x3   :  { %s118_s11 = scalar_lea.vmem %s16_s10, 256  ;;  %p123_p1 = scmp.lt.s32.totalorder %s16_s10, %s16_s10 }
   0x4   :  { %p119_p0 = scmp.ne.s32.totalorder %s16_s10, %s118_s11  ;;  %p124_p2 = scmp.lt.s32.totalorder %s118_s11, %s118_s11 }
   0x6   :  { %p125_p3 = por %p124_p2, %p123_p1 }
   0x8   :  { %p126_p4 = pnand %p125_p3, %p119_p0 }
   0xa   :  { %129 = shalt.err (!%p126_p4)
}
   0xb   :  { %18 = dma.hbm_to_vmem [thread:$0]  %s182_s0, 256, %s16_s10, [#allocation3]  }
   0xc   :  { %150 = dma.done.wait [#allocation3], 256  }
   0xd   :  { %151 = vsyncadd [#allocation3], 4294967040  ;;  %v155_v0 = vmov 0   ;;  %v26_v1 = vld [vmem:[%s183_s1] sm:$0xff]  ;;  %v25_v3 = vld [vmem:[#allocation2 + $0x8] sm:$0xff]  ;;  %v67_v31 = vlaneseq  ;;  %s157_s0 = smov [#allocation5]  }
   0xe   :  { %103 = vset.pattern.permute.xlu0 %v155_v0  ;;  %v24_v2 = vld [vmem:[#allocation2] sm:$0xff]  ;;  %v156_v29 = vmov 1966171168   ;;  %s90_s1 = sshll.u32 %s157_s0, 4  ;;  %s91_s1 = int_to_ptr.vmem [resolvable:$true] %s90_s1 }
   0xf   :  { %29 = vperm.xlu0 %103, %v26_v1   ;;  %v65_v30 = vunpack.c.l.s4 %v156_v29  ;;  %v68_v33 = vshrl.u32 %v67_v31, 7  ;;  %vm81_vm0 = vcmp.lt.s32.totalorder %v67_v31, 256  ;;  %s130_s16 = scalar_lea.vmem %s91_s1, 32  ;;  %p135_p6 = scmp.lt.s32.totalorder %s91_s1, %s91_s1 }
  0x10   :  { %p131_p5 = scmp.ne.s32.totalorder %s91_s1, %s130_s16  ;;  %p136_p7 = scmp.lt.s32.totalorder %s130_s16, %s130_s16 }
  0x11   :  { %v66_v32 = vunpack.c.0.s8 %v65_v30 }
  0x12   :  { %p137_p8 = por %p136_p7, %p135_p6 }
  0x13   :  { %v69_v37 = vsub.s32 %v66_v32, %v68_v33 }
  0x14   :  { %p138_p9 = pnand %p137_p8, %p131_p5 }
  0x8a   :  { %v30_v4 = vpop.permute.xlu0 %29 }
  0x8b   :  { %v32_v5 = vmul.f32 %v30_v4, %v24_v2  ;;  %v33_v6 = vmul.f32 %v30_v4, %v25_v3 }
  0x8d   :  { %v34_v7 = vrot.slane %v32_v5, 4  ;;  %v40_v8 = vrot.slane %v33_v6, 4 }
  0x8f   :  { %v35_v9 = vadd.f32 %v34_v7, %v32_v5  ;;  %v41_v10 = vadd.f32 %v40_v8, %v33_v6 }
  0x91   :  { %v36_v11 = vrot.slane %v35_v9, 2  ;;  %v42_v12 = vrot.slane %v41_v10, 2 }
  0x93   :  { %v37_v13 = vadd.f32 %v36_v11, %v35_v9  ;;  %v43_v14 = vadd.f32 %v42_v12, %v41_v10 }
  0x95   :  { %v38_v15 = vrot.slane %v37_v13, 1  ;;  %v44_v16 = vrot.slane %v43_v14, 1 }
  0x97   :  { %v39_v17 = vadd.f32 %v38_v15, %v37_v13  ;;  %v45_v18 = vadd.f32 %v44_v16, %v43_v14 }
  0x99   :  { %v46_v19 = vmax.f32 %v39_v17, %v45_v18 }
  0x9b   :  { %47 = vmax.xlane.f32.xlu0 %v46_v19 }
 0x124   :  { %v48_v20 = vpop.xlane.xlu0 %47 }
 0x125   :  { %v49_v21 = vsub.f32 %v39_v17, %v48_v20  ;;  %v50_v22 = vsub.f32 %v45_v18, %v48_v20 }
 0x127   :  { %v51_v23 = vmul.f32 1.442695, %v49_v21  ;;  %v53_v24 = vmul.f32 1.442695, %v50_v22 }
 0x129   :  { %104 = vpow2.f32 %v51_v23 }
 0x12a   :  { %106 = vpow2.f32 %v53_v24 }
 0x136   :  { %v105_v25 = vpop.eup %104 }
 0x137   :  { %v107_v26 = vpop.eup %106 }
 0x138   :  { %v55_v27 = vadd.f32 %v107_v26, %v105_v25 }
 0x13a   :  { %56 = vadd.xlane.f32.xlu1 %v55_v27 }
 0x1c3   :  { %v57_v28 = vpop.xlane.xlu1 %56 }
 0x1c4   :  { %108 = vrcp.f32 %v57_v28 }
 0x1d1   :  { %v109_v34 = vpop.eup %108 }
 0x1d2   :  { %v59_v35 = vmul.f32 %v109_v34, %v105_v25  ;;  %v60_v36 = vmul.f32 %v109_v34, %v107_v26 }
 0x1d4   :  { %v63_v38 = vcombine.low %v59_v35, %v60_v36 }
 0x1d6   :  { %v70_v39 = vrot.slane %v63_v38, %v69_v37 }
 0x1d8   :  { %v77_v40 = vrot.slane %v70_v39, %v69_v37 }
 0x1da   :  { %83 = vst.msk [vmem:[#allocation5] sm:$0x3] %vm81_vm0, %v77_v40 }
 0x1db   :  { %141 = shalt.err (!%p138_p9)
}
 0x1dc   :  { %93 = dma.vmem_to_hbm [thread:$0]  %s91_s1, 32, %s184_s2, [#allocation4]  }
 0x1dd   :  { %152 = dma.done.wait [#allocation4], 32  }
 0x1de   :  { %153 = vsyncadd [#allocation4], 4294967264 }
 0x1df   :  { %97 = vsyncpa [#allocation3], 1 }
 0x1e0   :  { %98 = vsyncpa [#allocation4], 1 }

</bundles_post_ra>
